<compile_context>
chip_gen: v7x
topology: tpu7x:2x2x1
jax: 0.10.0
libtpu: 0.0.40
codegen_flags: <defaults>
</compile_context>

<pallas_src>
import math

import jax
import jax.numpy as jnp
from jax.experimental import pallas as pl
from jax.experimental.pallas import tpu as pltpu


def _round_up(n, m):
    return ((n + m - 1) // m) * m


# ----------------------------------------------------------------------------
# Pallas kernel: one fused (TB, D) @ (D, P) matmul + bias, lane-dense output.
#   x_ref:   (TB, D) f32   (cast to bf16 in-kernel; free under the MXU)
#   w_ref:   (D, P)  bf16  (actor cols 0..H-1, critic col at H, zero padding)
#   b_ref:   (1, P)  f32
#   out_ref: (TB, P) f32
# ----------------------------------------------------------------------------
def _linearbase_fused_kernel(x_ref, w_ref, b_ref, out_ref):
    x_bf16 = x_ref[...].astype(jnp.bfloat16)
    out_ref[...] = (
        jnp.dot(x_bf16, w_ref[...], preferred_element_type=jnp.float32)
        + b_ref[...]
    )


def _pallas_fused_matmul(x, w_bf16, b_fused, batch_tile):
    """x (B, D) f32  @  w (D, P) bf16  + b (1, P) f32  ->  (B, P) f32."""
    B, D = x.shape
    P = w_bf16.shape[1]

    if B <= batch_tile:
        TB = max(8, _round_up(B, 8))       # single step; pad rows to sublanes
    else:
        TB = batch_tile                    # big tiles amortize per-step overhead
    B_pad = _round_up(B, TB)
    if B_pad != B:
        x = jnp.pad(x, ((0, B_pad - B), (0, 0)))
    grid = (B_pad // TB,)

    cost = pl.CostEstimate(
        flops=2 * B_pad * D * P,
        transcendentals=0,
        bytes_accessed=(B_pad * D * 4) + (D * P * 2) + (P * 4) + (B_pad * P * 4),
    )

    out = pl.pallas_call(
        _linearbase_fused_kernel,
        out_shape=jax.ShapeDtypeStruct((B_pad, P), jnp.float32),
        grid=grid,
        in_specs=[
            pl.BlockSpec((TB, D), lambda i: (i, 0)),   # x tile, pipelined over batch
            pl.BlockSpec((D, P), lambda i: (0, 0)),    # fused weights, resident
            pl.BlockSpec((1, P), lambda i: (0, 0)),    # fused bias row, resident
        ],
        out_specs=pl.BlockSpec((TB, P), lambda i: (i, 0)),
        compiler_params=pltpu.CompilerParams(
            dimension_semantics=("parallel",),         # batch steps across TCs (v7x)
        ),
        cost_estimate=cost,
    )(x, w_bf16, b_fused)
    return out[:B]


def make_linearbase_forward(actor_w, actor_b, critic_w, critic_b, *,
                            pallas_min_batch=512, batch_tile=4096):
    """Build the forward fn for LinearBase(recurrent=False).

    actor_w:  (H, D)  actor_b:  (H,)     -- PyTorch nn.Linear layout
    critic_w: (1, D)  critic_b: (1,)
    Weight-slab fusion is done ONCE here (not per forward call); the returned
    fn is jit-able and returns (hidden_critic, hidden_actor, rnn_hxs).
    """
    H, D = actor_w.shape
    P = _round_up(H + 1, 128)              # H=64 -> P=128

    w_fused = jnp.zeros((D, P), jnp.float32)
    w_fused = w_fused.at[:, :H].set(actor_w.T)
    w_fused = w_fused.at[:, H:H + 1].set(critic_w.T)
    b_fused = jnp.zeros((1, P), jnp.float32)
    b_fused = b_fused.at[0, :H].set(actor_b)
    b_fused = b_fused.at[0, H].set(critic_b[0])

    w_bf16 = w_fused.astype(jnp.bfloat16)  # bf16 operands, f32 accumulation

    def forward(x, rnn_hxs, masks):
        del masks                          # unused when non-recurrent
        B = x.shape[0]
        if B < pallas_min_batch:
            # Tiny batch: fused XLA GEMM+bias beats pallas fixed overheads.
            out = jnp.dot(x.astype(jnp.bfloat16), w_bf16,
                          preferred_element_type=jnp.float32) + b_fused
        else:
            out = _pallas_fused_matmul(x, w_bf16, b_fused, batch_tile)
        hidden_actor = out[:, :H]
        hidden_critic = out[:, H:H + 1]
        return hidden_critic, hidden_actor, rnn_hxs

    # TODO(synk): recurrent=True GRU path (_forward_gru) not implemented; this
    # module instance is non-recurrent so forward() never reaches it.
    return forward


# ----------------------------------------------------------------------------
# Deterministic parameter init (orthogonal, gain=sqrt(2); biases zero) —
# mirrors init(m, orthogonal_, constant_(0), np.sqrt(2)) from the module.
# ----------------------------------------------------------------------------
def orthogonal_init(key, out_features, in_features, gain):
    rows, cols = out_features, in_features
    transpose = rows < cols
    shape = (cols, rows) if transpose else (rows, cols)
    a = jax.random.normal(key, shape, dtype=jnp.float32)
    q, r = jnp.linalg.qr(a)
    q = q * jnp.sign(jnp.diagonal(r))
    if transpose:
        q = q.T
    return gain * q                        # (out_features, in_features)


if __name__ == "__main__":
    num_inputs = 32
    hidden_size = 64
    batch = 8
    gain = math.sqrt(2.0)

    key = jax.random.PRNGKey(0)
    k_x, k_xl, k_a, k_c, k_cl = jax.random.split(key, 5)

    # Parameters (shapes per LinearBase.__init__, PyTorch nn.Linear layout).
    actor_w = orthogonal_init(k_a, hidden_size, num_inputs, gain)    # (64, 32)
    actor_b = jnp.zeros((hidden_size,), jnp.float32)
    critic_w = orthogonal_init(k_c, 1, num_inputs, gain)             # (1, 32)
    critic_b = jnp.zeros((1,), jnp.float32)
    # critic_linear is defined in __init__ but unused in forward().
    critic_linear_w = orthogonal_init(k_cl, 1, hidden_size, gain)    # unused
    critic_linear_b = jnp.zeros((1,), jnp.float32)                   # unused

    def ref_bf16(xi):
        # Matches the kernel's MXU math (bf16 operands, f32 accumulate).
        xb = xi.astype(jnp.bfloat16).astype(jnp.float32)
        awb = actor_w.astype(jnp.bfloat16).astype(jnp.float32)
        cwb = critic_w.astype(jnp.bfloat16).astype(jnp.float32)
        return xb @ cwb.T + critic_b[None, :], xb @ awb.T + actor_b[None, :]

    # ---- 1) Pallas path forced at small batch (exercises the kernel) -------
    fwd_pallas = jax.jit(make_linearbase_forward(
        actor_w, actor_b, critic_w, critic_b, pallas_min_batch=1))
    x = jax.random.normal(k_x, (batch, num_inputs), dtype=jnp.float32)
    rnn_hxs = jnp.zeros((batch, 1), jnp.float32)   # recurrent_hidden_state_size=1
    masks = jnp.ones((batch, 1), jnp.float32)

    hidden_critic, hidden_actor, rnn_hxs_out = jax.block_until_ready(
        fwd_pallas(x, rnn_hxs, masks))

    ref_c, ref_a = ref_bf16(x)
    assert hidden_critic.shape == (batch, 1)
    assert hidden_actor.shape == (batch, hidden_size)
    assert jnp.allclose(hidden_actor, ref_a, atol=1e-5, rtol=1e-5)
    assert jnp.allclose(hidden_critic, ref_c, atol=1e-5, rtol=1e-5)
    # Loose check against full-f32 module semantics (bf16 operand rounding).
    assert jnp.allclose(hidden_actor, x @ actor_w.T + actor_b[None, :],
                        atol=3e-2, rtol=3e-2)
    assert jnp.allclose(hidden_critic, x @ critic_w.T + critic_b[None, :],
                        atol=3e-2, rtol=3e-2)
    assert jnp.array_equal(rnn_hxs_out, rnn_hxs)

    # ---- 2) Pallas multi-step grid + batch padding --------------------------
    B_large = 1000
    fwd_pallas_tiled = jax.jit(make_linearbase_forward(
        actor_w, actor_b, critic_w, critic_b, pallas_min_batch=1, batch_tile=256))
    xl = jax.random.normal(k_xl, (B_large, num_inputs), dtype=jnp.float32)
    hc_l, ha_l, _ = jax.block_until_ready(
        fwd_pallas_tiled(xl, jnp.zeros((B_large, 1), jnp.float32),
                         jnp.ones((B_large, 1), jnp.float32)))
    ref_cl, ref_al = ref_bf16(xl)
    assert ha_l.shape == (B_large, hidden_size) and hc_l.shape == (B_large, 1)
    assert jnp.allclose(ha_l, ref_al, atol=1e-5, rtol=1e-5)
    assert jnp.allclose(hc_l, ref_cl, atol=1e-5, rtol=1e-5)

    # ---- 3) Auto path (tiny batch -> fused XLA GEMM+bias, no pallas) -------
    fwd_auto = jax.jit(make_linearbase_forward(
        actor_w, actor_b, critic_w, critic_b))
    hc2, ha2, _ = jax.block_until_ready(fwd_auto(x, rnn_hxs, masks))
    assert jnp.allclose(ha2, ref_a, atol=1e-5, rtol=1e-5)
    assert jnp.allclose(hc2, ref_c, atol=1e-5, rtol=1e-5)

    print("KERNEL_OK")
</pallas_src>

<mosaic_0001>
module attributes {stable_mosaic.version = 11 : i64} {
  func.func @_linearbase_fused_kernel(%arg0: i32, %arg1: memref<8x32xf32, #tpu.memory_space<vmem>>, %arg2: memref<32x128xbf16, #tpu.memory_space<vmem>>, %arg3: memref<1x128xf32, #tpu.memory_space<vmem>>, %arg4: memref<8x128xf32, #tpu.memory_space<vmem>>) attributes {dimension_semantics = [#tpu.dimension_semantics<parallel>], iteration_bounds = array<i64: 1>, scalar_prefetch = 0 : i64, scratch_operands = 0 : i64, tpu.core_type = #tpu.core_type<tc>, window_params = [{transform_indices = @transform_0, window_bounds = array<i64: 8, 32>}, {pipeline_mode = #tpu.pipeline_mode<synchronous>, transform_indices = @transform_1, window_bounds = array<i64: 32, 128>}, {pipeline_mode = #tpu.pipeline_mode<synchronous>, transform_indices = @transform_2, window_bounds = array<i64: 1, 128>}, {transform_indices = @transform_3, window_bounds = array<i64: 8, 128>}]} {
    %c0 = arith.constant 0 : index
    %c0_0 = arith.constant 0 : index
    %0 = vector.load %arg1[%c0, %c0_0] : memref<8x32xf32, #tpu.memory_space<vmem>>, vector<8x32xf32>
    %1 = arith.truncf %0 : vector<8x32xf32> to vector<8x32xbf16>
    %c0_1 = arith.constant 0 : index
    %c0_2 = arith.constant 0 : index
    %2 = vector.load %arg2[%c0_1, %c0_2] : memref<32x128xbf16, #tpu.memory_space<vmem>>, vector<32x128xbf16>
    %cst = arith.constant dense<0.000000e+00> : vector<8x128xf32>
    %3 = tpu.matmul %1, %2, %cst {dimension_numbers = #tpu.dot_dimension_numbers<[1], [0], [0], [1], [0, 0, 1, 1], [], []>} : vector<8x32xbf16>, vector<32x128xbf16>, vector<8x128xf32> -> vector<8x128xf32>
    %c0_3 = arith.constant 0 : index
    %c0_4 = arith.constant 0 : index
    %4 = vector.load %arg3[%c0_3, %c0_4] : memref<1x128xf32, #tpu.memory_space<vmem>>, vector<1x128xf32>
    %5 = vector.broadcast %4 : vector<1x128xf32> to vector<8x128xf32>
    %6 = arith.addf %3, %5 : vector<8x128xf32>
    %c0_5 = arith.constant 0 : index
    %c0_6 = arith.constant 0 : index
    %7 = vector.load %arg4[%c0_5, %c0_6] : memref<8x128xf32, #tpu.memory_space<vmem>>, vector<8x128xf32>
    tpu.vector_store %arg4[%c0_5, %c0_6], %6 {strides = array<i32>} : memref<8x128xf32, #tpu.memory_space<vmem>>, vector<8x128xf32>,
    return
  }
  func.func @transform_0(%arg0: i32) -> (i32, i32) {
    %c0_i32 = arith.constant 0 : i32
    %c0_i32_0 = arith.constant 0 : i32
    return %arg0, %c0_i32 : i32, i32
  }
  func.func @transform_1(%arg0: i32) -> (i32, i32) {
    %c0_i32 = arith.constant 0 : i32
    %c0_i32_0 = arith.constant 0 : i32
    %c0_i32_1 = arith.constant 0 : i32
    return %c0_i32, %c0_i32_0 : i32, i32
  }
  func.func @transform_2(%arg0: i32) -> (i32, i32) {
    %c0_i32 = arith.constant 0 : i32
    %c0_i32_0 = arith.constant 0 : i32
    %c0_i32_1 = arith.constant 0 : i32
    return %c0_i32, %c0_i32_0 : i32, i32
  }
  func.func @transform_3(%arg0: i32) -> (i32, i32) {
    %c0_i32 = arith.constant 0 : i32
    %c0_i32_0 = arith.constant 0 : i32
    return %arg0, %c0_i32 : i32, i32
  }
}

</mosaic_0001>

<bundles_post_ra>
// kernel: forward.1
= control target key start
LH: loop header
LB: loop body
LE: loop exit
PB: predicated region body
PF: predicated region fallthrough
CT: control target
= control target key end

     0   :  { %8 = vsyncpa [#allocation3], 0  ;;  %s146_s12 = smov [#allocation2]   ;;  %s193_s0 = inlined_call_operand.hbm [shape: f32[8,32], index: 0, kind: input, shape index: {}]   ;;  %s194_s1 = inlined_call_operand.vmem [shape: bf16[32,128], index: 1, kind: input, shape index: {}]   ;;  %s195_s2 = inlined_call_operand.vmem [shape: f32[1,128], index: 2, kind: input, shape index: {}]   ;;  %s196_s3 = inlined_call_operand.vmem [shape: f32[8,128], index: 3, kind: output, shape index: {}]  }
   0x1   :  { %s15_s13 = sshll.u32 %s146_s12, 4  ;;  %s122_s16 = scalar_lea.hbm %s193_s0, 128  ;;  %s16_s13 = int_to_ptr.vmem [resolvable:$true] %s15_s13 }
   0x2   :  { %p123_p0 = scmp.ne.s32.totalorder %s193_s0, %s122_s16  ;;  %p126_p1 = scmp.lt.u32.totalorder %s122_s16, %s193_s0 }
   0x4   :  { %p128_p2 = pnand %p126_p1, %p123_p0 }
   0x6   :  { %131 = shalt.err (!%p128_p2)
}
   0x7   :  { %s132_s21 = scalar_lea.vmem %s16_s13, 128  ;;  %p137_p4 = scmp.lt.s32.totalorder %s16_s13, %s16_s13 }
   0x8   :  { %p133_p3 = scmp.ne.s32.totalorder %s16_s13, %s132_s21  ;;  %p138_p5 = scmp.lt.s32.totalorder %s132_s21, %s132_s21 }
   0xa   :  { %p139_p6 = por %p138_p5, %p137_p4 }
   0xc   :  { %p140_p7 = pnand %p139_p6, %p133_p3 }
   0xe   :  { %143 = shalt.err (!%p140_p7)
}
   0xf   :  { %18 = dma.hbm_to_vmem [thread:$0]  %s193_s0, 128, %s16_s13, [#allocation3]  }
  0x10   :  { %144 = dma.done.wait [#allocation3], 128  }
  0x11   :  { %145 = vsyncadd [#allocation3], 4294967168  ;;  %v147_v0 = vmov 0.0   ;;  %vm148_vm0 = vmmov 0   ;;  %v120_v1 = vld [vmem:[%s194_s1] sm:$0xff]   ;;  %v121_v2 = vld [vmem:[%s194_s1 + $0x8] sm:$0xff]  }
  0x12   :  { %109 = vmatprep.subr.bf16.mxu0 %v147_v0  ;;  %113 = vmatprep.mubr.msk.bf16.mxu0 %vm148_vm0, %v147_v0  ;;  %v27_v3 = vld [vmem:[#allocation2] sm:$0xff]  ;;  %vm52_vm1 = vcmask 261120  }
  0x13   :  { %110 = vmatpush3.bf16.msra.mxu0 %v120_v1  ;;  %v28_v4 = vpack.c.bf16 %v27_v3, %v27_v3  ;;  %v102_v5 = vld [vmem:[%s195_s2] ss:$0 sm:$0xff] }
  0x14   :  { %111 = vmatprep.subr.bf16.mxu0 %v147_v0 }
  0x17   :  { %112 = vmatpush3.bf16.msra.mxu0 %v121_v2 }
  0x1a   :  { %114 = vmatmul.mubr.msk.bf16.vlgmr.msra.gmra.mrb[0].mxu0 %vm52_vm1, %v28_v4 }
  0xed   :  { %v90_v6 = vpop.f32.mrb[0].mxu0 }
  0xee   :  { %v91_v7 = vadd.f32 %v102_v5, %v90_v6  ;;  %v115_v8 = vpop.f32.mrb[1].mxu0 }
  0xef   :  { %v93_v9 = vpop.f32.mrb[2].mxu0 }
  0xf0   :  { %96 = vst [vmem:[%s196_s3] sm:$0xff] %v91_v7  ;;  %v116_v10 = vpop.f32.mrb[3].mxu0 }
  0xf1   :  { %101 = vsyncpa [#allocation3], 1 }

</bundles_post_ra>
